<compile_context>
chip_gen: v6e
topology: v6e:2x2x1
jax: 0.10.0
libtpu: 0.0.40
codegen_flags: <defaults>
</compile_context>

<pallas_src>
import jax
import jax.numpy as jnp
from jax import lax
from jax.experimental import pallas as pl
from jax.experimental.pallas import tpu as pltpu


def _alarmwork_kernel(x_ref,          # (T*B, I)   all timesteps, step-major
                      w_in_ref,       # (I, 2H)    [W_in1 | W_in2]
                      b_in_ref,       # (1, 2H)    [b_in1 | b_in2]
                      w_rec_even_ref, # (2H, 2H)   [[W_rec1,0],[W_rec1,0]]
                      w_rec_odd_ref,  # (2H, 2H)   [[W_rec1,0],[W_rec1,W_rec2]]
                      w_out_ref,      # (2H, O)    [[W_out],[0]]
                      b_out_ref,      # (1, O)
                      o_ref):         # (B, O)
    TB = x_ref.shape[0]
    B, _ = o_ref.shape
    T = TB // B
    H2 = w_rec_odd_ref.shape[0]
    H = H2 // 2

    # --- recurrence-independent work, done once -------------------------
    # All T input projections for both layers (+ biases) in a single matmul.
    proj = (jnp.dot(x_ref[...], w_in_ref[...],
                    preferred_element_type=jnp.float32)
            + b_in_ref[...])                                  # (T*B, 2H)

    # Small (<= 8 vregs each) unpadded weights: hoisting is free.
    w_even = w_rec_even_ref[...]
    w_odd = w_rec_odd_ref[...]

    # First H lanes hold the layer-1 state, last H lanes the layer-2 state.
    layer1_lanes = lax.broadcasted_iota(jnp.int32, (B, H2), 1) < H

    zcat = jnp.zeros((B, H2), jnp.float32)                    # [z1 | z2]

    # seq_len is a small compile-time constant: statically unrolled loop, so
    # the even/odd layer-2 behaviour is resolved at trace time (no runtime
    # branching, no discarded MXU work beyond a half-vreg tanh on even steps).
    for step in range(T):
        p = proj[step * B:(step + 1) * B, :]                  # (B, 2H), aligned
        if step % 2 == 1:
            # [ (z1+z2)@W_rec1 | z2@W_rec2 ] via one block-structured matmul.
            a = p + jnp.dot(zcat, w_odd, preferred_element_type=jnp.float32)
            zcat = jnp.tanh(a)
        else:
            # Layer 2 is the identity on even steps: update only layer-1 lanes.
            a = p + jnp.dot(zcat, w_even, preferred_element_type=jnp.float32)
            zcat = jnp.where(layer1_lanes, jnp.tanh(a), zcat)

    # Output projection exactly once, after the final step.
    o_ref[...] = jnp.tanh(
        jnp.dot(zcat, w_out_ref[...], preferred_element_type=jnp.float32)
        + b_out_ref[...])


# --------------------------- wrapper ---------------------------------------

def prepare_params(params):
    """One-time fusion/stacking of the weights (constants at inference)."""
    H = params["W_rec1"].shape[0]
    O = params["W_out"].shape[1]
    zhh = jnp.zeros((H, H), jnp.float32)
    w1, w2 = params["W_rec1"], params["W_rec2"]
    return {
        # [z1|z2] @ W_in-side stacking for the pre-projection.
        "W_in_cat": jnp.concatenate([params["W_in1"], params["W_in2"]], axis=1),
        "b_in_cat": jnp.concatenate([params["b_in1"], params["b_in2"]]
                                    ).reshape(1, 2 * H),
        # [z1|z2] @ W_rec_odd  = [ (z1+z2)@W_rec1 | z2@W_rec2 ]
        "W_rec_odd": jnp.block([[w1, zhh], [w1, w2]]),
        # [z1|z2] @ W_rec_even = [ (z1+z2)@W_rec1 | 0 ]   (layer-2 lanes kept)
        "W_rec_even": jnp.block([[w1, zhh], [w1, zhh]]),
        # [z1|z2] @ W_out_ext  = z1 @ W_out
        "W_out_ext": jnp.concatenate(
            [params["W_out"], jnp.zeros((H, O), jnp.float32)], axis=0),
        "b_out": params["b_out"].reshape(1, O),
    }


def alarmwork_rnn_forward(x, prep):
    """x: (batch, seq_len, num_inputs) f32. Returns (batch, num_outputs)."""
    B, T, I = x.shape
    O = prep["W_out_ext"].shape[1]

    # (B, T, I) -> (T, B, I) -> (T*B, I): per-step row blocks are contiguous
    # and sublane-aligned inside the kernel.
    x_tb = jnp.transpose(x, (1, 0, 2)).reshape(T * B, I)

    vmem = pl.BlockSpec(memory_space=pltpu.MemorySpace.VMEM)
    return pl.pallas_call(
        _alarmwork_kernel,
        out_shape=jax.ShapeDtypeStruct((B, O), jnp.float32),
        in_specs=[vmem] * 7,          # whole arrays resident in VMEM, no grid
        out_specs=vmem,
    )(x_tb, prep["W_in_cat"], prep["b_in_cat"], prep["W_rec_even"],
      prep["W_rec_odd"], prep["W_out_ext"], prep["b_out"])


# ----------------------- parameter init & reference -------------------------

def _xavier_uniform(key, shape, dtype=jnp.float32):
    fan_in, fan_out = shape
    bound = jnp.sqrt(6.0 / (fan_in + fan_out))
    return jax.random.uniform(key, shape, dtype, minval=-bound, maxval=bound)


def init_params(key, num_inputs, num_hidden, num_outputs):
    k1, k2, k3, k4, k5 = jax.random.split(key, 5)
    return {
        "W_in1": _xavier_uniform(k1, (num_inputs, num_hidden)),
        "b_in1": jnp.zeros((num_hidden,), jnp.float32),
        "W_rec1": _xavier_uniform(k2, (num_hidden, num_hidden)),
        "W_in2": _xavier_uniform(k3, (num_inputs, num_hidden)),
        "b_in2": jnp.zeros((num_hidden,), jnp.float32),
        "W_rec2": _xavier_uniform(k4, (num_hidden, num_hidden)),
        "W_out": _xavier_uniform(k5, (num_hidden, num_outputs)),
        "b_out": jnp.zeros((num_outputs,), jnp.float32),
    }


def reference_forward(x, params):
    """Pure-JAX mirror of the PyTorch AlarmworkRNN.forward (scalar=False)."""
    B, T, _ = x.shape
    H = params["W_rec1"].shape[0]
    z1 = jnp.zeros((B, H), jnp.float32)
    z2 = jnp.zeros((B, H), jnp.float32)
    z_out = None
    for step in range(T):
        el = x[:, step, :]
        z12 = z1 + z2
        z1_new = jnp.tanh(el @ params["W_in1"] + z12 @ params["W_rec1"]
                          + params["b_in1"])
        if step % 2 == 0:
            z2_new = z2
        else:
            z2_new = jnp.tanh(el @ params["W_in2"] + z2 @ params["W_rec2"]
                              + params["b_in2"])
        z1, z2 = z1_new, z2_new
        z_out = jnp.tanh(z1 @ params["W_out"] + params["b_out"])
    return z_out


if __name__ == "__main__":
    # Small shapes consistent with the module's constructor.
    batch, seq_len = 8, 8
    num_inputs, num_hidden, num_outputs = 16, 32, 4

    key = jax.random.PRNGKey(0)
    kx, kp = jax.random.split(key)
    x = jax.random.normal(kx, (batch, seq_len, num_inputs), jnp.float32)
    params = init_params(kp, num_inputs, num_hidden, num_outputs)

    prep = jax.tree_util.tree_map(jax.block_until_ready, prepare_params(params))

    out = jax.block_until_ready(alarmwork_rnn_forward(x, prep))
    ref = reference_forward(x, params)

    assert out.shape == (batch, num_outputs)
    assert jnp.allclose(out, ref, atol=3e-5, rtol=3e-5), "mismatch vs reference"

    print("KERNEL_OK")
</pallas_src>

<mosaic_0001>
module attributes {stable_mosaic.version = 11 : i64} {
  func.func @_alarmwork_kernel(%arg0: memref<64x16xf32, #tpu.memory_space<vmem>>, %arg1: memref<16x64xf32, #tpu.memory_space<vmem>>, %arg2: memref<1x64xf32, #tpu.memory_space<vmem>>, %arg3: memref<64x64xf32, #tpu.memory_space<vmem>>, %arg4: memref<64x64xf32, #tpu.memory_space<vmem>>, %arg5: memref<64x4xf32, #tpu.memory_space<vmem>>, %arg6: memref<1x4xf32, #tpu.memory_space<vmem>>, %arg7: memref<8x4xf32, #tpu.memory_space<vmem>>) attributes {dimension_semantics = [], scalar_prefetch = 0 : i64, scratch_operands = 0 : i64, tpu.core_type = #tpu.core_type<tc>} {
    %c0 = arith.constant 0 : index
    %c0_0 = arith.constant 0 : index
    %0 = vector.load %arg0[%c0, %c0_0] : memref<64x16xf32, #tpu.memory_space<vmem>>, vector<64x16xf32>
    %c0_1 = arith.constant 0 : index
    %c0_2 = arith.constant 0 : index
    %1 = vector.load %arg1[%c0_1, %c0_2] : memref<16x64xf32, #tpu.memory_space<vmem>>, vector<16x64xf32>
    %cst = arith.constant dense<0.000000e+00> : vector<64x64xf32>
    %2 = tpu.matmul %0, %1, %cst {dimension_numbers = #tpu.dot_dimension_numbers<[1], [0], [0], [1], [0, 0, 1, 1], [], []>} : vector<64x16xf32>, vector<16x64xf32>, vector<64x64xf32> -> vector<64x64xf32>
    %c0_3 = arith.constant 0 : index
    %c0_4 = arith.constant 0 : index
    %3 = vector.load %arg2[%c0_3, %c0_4] : memref<1x64xf32, #tpu.memory_space<vmem>>, vector<1x64xf32>
    %4 = vector.broadcast %3 : vector<1x64xf32> to vector<64x64xf32>
    %5 = arith.addf %2, %4 : vector<64x64xf32>
    %c0_5 = arith.constant 0 : index
    %c0_6 = arith.constant 0 : index
    %6 = vector.load %arg3[%c0_5, %c0_6] : memref<64x64xf32, #tpu.memory_space<vmem>>, vector<64x64xf32>
    %c0_7 = arith.constant 0 : index
    %c0_8 = arith.constant 0 : index
    %7 = vector.load %arg4[%c0_7, %c0_8] : memref<64x64xf32, #tpu.memory_space<vmem>>, vector<64x64xf32>
    %8 = tpu.iota {dimensions = array<i32: 1>} : vector<8x64xi32>
    %c32_i32 = arith.constant 32 : i32
    %9 = vector.broadcast %c32_i32 : i32 to vector<8x64xi32>
    %10 = arith.cmpi slt, %8, %9 : vector<8x64xi32>
    %cst_9 = arith.constant 0.000000e+00 : f32
    %11 = vector.broadcast %cst_9 : f32 to vector<8x64xf32>
    %12 = vector.extract_strided_slice %5 {offsets = [0, 0], sizes = [8, 64], strides = [1, 1]} : vector<64x64xf32> to vector<8x64xf32>
    %cst_10 = arith.constant dense<0.000000e+00> : vector<8x64xf32>
    %13 = tpu.matmul %11, %6, %cst_10 {dimension_numbers = #tpu.dot_dimension_numbers<[1], [0], [0], [1], [0, 0, 1, 1], [], []>} : vector<8x64xf32>, vector<64x64xf32>, vector<8x64xf32> -> vector<8x64xf32>
    %14 = arith.addf %12, %13 : vector<8x64xf32>
    %15 = math.tanh %14 : vector<8x64xf32>
    %16 = arith.select %10, %15, %11 : vector<8x64xi1>, vector<8x64xf32>
    %17 = vector.extract_strided_slice %5 {offsets = [8, 0], sizes = [8, 64], strides = [1, 1]} : vector<64x64xf32> to vector<8x64xf32>
    %cst_11 = arith.constant dense<0.000000e+00> : vector<8x64xf32>
    %18 = tpu.matmul %16, %7, %cst_11 {dimension_numbers = #tpu.dot_dimension_numbers<[1], [0], [0], [1], [0, 0, 1, 1], [], []>} : vector<8x64xf32>, vector<64x64xf32>, vector<8x64xf32> -> vector<8x64xf32>
    %19 = arith.addf %17, %18 : vector<8x64xf32>
    %20 = math.tanh %19 : vector<8x64xf32>
    %21 = vector.extract_strided_slice %5 {offsets = [16, 0], sizes = [8, 64], strides = [1, 1]} : vector<64x64xf32> to vector<8x64xf32>
    %cst_12 = arith.constant dense<0.000000e+00> : vector<8x64xf32>
    %22 = tpu.matmul %20, %6, %cst_12 {dimension_numbers = #tpu.dot_dimension_numbers<[1], [0], [0], [1], [0, 0, 1, 1], [], []>} : vector<8x64xf32>, vector<64x64xf32>, vector<8x64xf32> -> vector<8x64xf32>
    %23 = arith.addf %21, %22 : vector<8x64xf32>
    %24 = math.tanh %23 : vector<8x64xf32>
    %25 = arith.select %10, %24, %20 : vector<8x64xi1>, vector<8x64xf32>
    %26 = vector.extract_strided_slice %5 {offsets = [24, 0], sizes = [8, 64], strides = [1, 1]} : vector<64x64xf32> to vector<8x64xf32>
    %cst_13 = arith.constant dense<0.000000e+00> : vector<8x64xf32>
    %27 = tpu.matmul %25, %7, %cst_13 {dimension_numbers = #tpu.dot_dimension_numbers<[1], [0], [0], [1], [0, 0, 1, 1], [], []>} : vector<8x64xf32>, vector<64x64xf32>, vector<8x64xf32> -> vector<8x64xf32>
    %28 = arith.addf %26, %27 : vector<8x64xf32>
    %29 = math.tanh %28 : vector<8x64xf32>
    %30 = vector.extract_strided_slice %5 {offsets = [32, 0], sizes = [8, 64], strides = [1, 1]} : vector<64x64xf32> to vector<8x64xf32>
    %cst_14 = arith.constant dense<0.000000e+00> : vector<8x64xf32>
    %31 = tpu.matmul %29, %6, %cst_14 {dimension_numbers = #tpu.dot_dimension_numbers<[1], [0], [0], [1], [0, 0, 1, 1], [], []>} : vector<8x64xf32>, vector<64x64xf32>, vector<8x64xf32> -> vector<8x64xf32>
    %32 = arith.addf %30, %31 : vector<8x64xf32>
    %33 = math.tanh %32 : vector<8x64xf32>
    %34 = arith.select %10, %33, %29 : vector<8x64xi1>, vector<8x64xf32>
    %35 = vector.extract_strided_slice %5 {offsets = [40, 0], sizes = [8, 64], strides = [1, 1]} : vector<64x64xf32> to vector<8x64xf32>
    %cst_15 = arith.constant dense<0.000000e+00> : vector<8x64xf32>
    %36 = tpu.matmul %34, %7, %cst_15 {dimension_numbers = #tpu.dot_dimension_numbers<[1], [0], [0], [1], [0, 0, 1, 1], [], []>} : vector<8x64xf32>, vector<64x64xf32>, vector<8x64xf32> -> vector<8x64xf32>
    %37 = arith.addf %35, %36 : vector<8x64xf32>
    %38 = math.tanh %37 : vector<8x64xf32>
    %39 = vector.extract_strided_slice %5 {offsets = [48, 0], sizes = [8, 64], strides = [1, 1]} : vector<64x64xf32> to vector<8x64xf32>
    %cst_16 = arith.constant dense<0.000000e+00> : vector<8x64xf32>
    %40 = tpu.matmul %38, %6, %cst_16 {dimension_numbers = #tpu.dot_dimension_numbers<[1], [0], [0], [1], [0, 0, 1, 1], [], []>} : vector<8x64xf32>, vector<64x64xf32>, vector<8x64xf32> -> vector<8x64xf32>
    %41 = arith.addf %39, %40 : vector<8x64xf32>
    %42 = math.tanh %41 : vector<8x64xf32>
    %43 = arith.select %10, %42, %38 : vector<8x64xi1>, vector<8x64xf32>
    %44 = vector.extract_strided_slice %5 {offsets = [56, 0], sizes = [8, 64], strides = [1, 1]} : vector<64x64xf32> to vector<8x64xf32>
    %cst_17 = arith.constant dense<0.000000e+00> : vector<8x64xf32>
    %45 = tpu.matmul %43, %7, %cst_17 {dimension_numbers = #tpu.dot_dimension_numbers<[1], [0], [0], [1], [0, 0, 1, 1], [], []>} : vector<8x64xf32>, vector<64x64xf32>, vector<8x64xf32> -> vector<8x64xf32>
    %46 = arith.addf %44, %45 : vector<8x64xf32>
    %47 = math.tanh %46 : vector<8x64xf32>
    %c0_18 = arith.constant 0 : index
    %c0_19 = arith.constant 0 : index
    %48 = vector.load %arg5[%c0_18, %c0_19] : memref<64x4xf32, #tpu.memory_space<vmem>>, vector<64x4xf32>
    %cst_20 = arith.constant dense<0.000000e+00> : vector<8x4xf32>
    %49 = tpu.matmul %47, %48, %cst_20 {dimension_numbers = #tpu.dot_dimension_numbers<[1], [0], [0], [1], [0, 0, 1, 1], [], []>} : vector<8x64xf32>, vector<64x4xf32>, vector<8x4xf32> -> vector<8x4xf32>
    %c0_21 = arith.constant 0 : index
    %c0_22 = arith.constant 0 : index
    %50 = vector.load %arg6[%c0_21, %c0_22] : memref<1x4xf32, #tpu.memory_space<vmem>>, vector<1x4xf32>
    %51 = vector.broadcast %50 : vector<1x4xf32> to vector<8x4xf32>
    %52 = arith.addf %49, %51 : vector<8x4xf32>
    %53 = math.tanh %52 : vector<8x4xf32>
    %c0_23 = arith.constant 0 : index
    %c0_24 = arith.constant 0 : index
    %54 = vector.load %arg7[%c0_23, %c0_24] : memref<8x4xf32, #tpu.memory_space<vmem>>, vector<8x4xf32>
    tpu.vector_store %arg7[%c0_23, %c0_24], %53 {strides = array<i32>} : memref<8x4xf32, #tpu.memory_space<vmem>>, vector<8x4xf32>,
    return
  }
}

</mosaic_0001>

<bundles_post_ra>
// kernel: tpu_custom_call.1
= control target key start
LH: loop header
LB: loop body
LE: loop exit
PB: predicated region body
PF: predicated region fallthrough
CT: control target
= control target key end

     0   :  { %v1208_v0 = vmov 0.0   ;;  %vm1209_vm0 = vmmov 0   ;;  %vm43_vm1 = vcmask 130048   ;;  %v189_v34 = vlaneseq  ;;  %s1597_s3 = inlined_call_operand.vmem [shape: f32[64,64], index: 3, kind: input, shape index: {}]   ;;  %s1598_s1 = inlined_call_operand.vmem [shape: f32[16,64], index: 1, kind: input, shape index: {}]   ;;  %s1599_s0 = inlined_call_operand.vmem [shape: f32[64,16], index: 0, kind: input, shape index: {}]   ;;  %s1600_s4 = inlined_call_operand.vmem [shape: f32[64,64], index: 4, kind: input, shape index: {}]   ;;  %s1601_s2 = inlined_call_operand.vmem [shape: f32[1,64], index: 2, kind: input, shape index: {}]   ;;  %s1602_s5 = inlined_call_operand.vmem [shape: f32[64,4], index: 5, kind: input, shape index: {}]   ;;  %s1603_s6 = inlined_call_operand.vmem [shape: f32[1,4], index: 6, kind: input, shape index: {}]   ;;  %s1604_s7 = inlined_call_operand.vmem [shape: f32[8,4], index: 7, kind: output, shape index: {}]  }
   0x1   :  { %1017 = vmatprep.subr.mxu1 %v1208_v0  ;;  %v1254_v1 = vld [vmem:[%s1597_s3 + $0x38] sm:$0xff]  ;;  %v1259_v2 = vld [vmem:[%s1597_s3 + $0x30] sm:$0xff]  ;;  %1033 = vmatprep.mubr.msk.f32.mxu1 %vm1209_vm0, %v1208_v0  ;;  %v35_v3 = vld [vmem:[%s1598_s1 + $0x8] sm:$0xff]  ;;  %vm192_vm3 = vcmask 523264   ;;  %vm886_vm4 = vcmask 31744  }
   0x2   :  { %1018 = vmatpush3.msra.mxu1 %v1254_v1  ;;  %v34_v4 = vld [vmem:[%s1598_s1] sm:$0xff]  ;;  %v1274_v5 = vld [vmem:[%s1597_s3 + $0x28] sm:$0xff]  ;;  %1001 = vmatprep.subr.mxu0 %v35_v3  ;;  %v1295_v9 = vld [vmem:[%s1597_s3 + $0x18] sm:$0xff]  ;;  %v1431_v35 = vand.u32 127, %v189_v34 }
   0x3   :  { %1019 = vmatprep.subr.mxu1 %v1208_v0  ;;  %1002 = vmatpush3.msra.mxu0 %v35_v3  ;;  %v26_v6 = vld [vmem:[%s1599_s0] sm:$0xff]  ;;  %v27_v8 = vld [vmem:[%s1599_s0 + $0x8] sm:$0xff]  ;;  %v1303_v10 = vld [vmem:[%s1597_s3 + $0x10] sm:$0xff] }
   0x4   :  { %1020 = vmatpush3.msra.mxu1 %v1259_v2  ;;  %v1284_v7 = vld [vmem:[%s1597_s3 + $0x20] sm:$0xff]  ;;  %1003 = vmatprep.subr.mxu0 %v34_v4  ;;  %v1311_v11 = vld [vmem:[%s1597_s3 + $0x8] sm:$0xff]  ;;  %v1346_v13 = vld [vmem:[%s1600_s4 + $0x38] sm:$0xff]  ;;  %vm191_vm2 = vcmp.lt.s32.totalorder %v1431_v35, 32 }
   0x5   :  { %1021 = vmatprep.subr.mxu1 %v1208_v0  ;;  %1004 = vmatpush3.msra.mxu0 %v34_v4  ;;  %v1318_v12 = vld [vmem:[%s1597_s3] sm:$0xff]  ;;  %v28_v14 = vld [vmem:[%s1599_s0 + $0x10] sm:$0xff]  ;;  %v29_v15 = vld [vmem:[%s1599_s0 + $0x18] sm:$0xff] }
   0x6   :  { %1022 = vmatpush3.msra.mxu1 %v1274_v5  ;;  %1005 = vmatprep.mubr.msk.f32.mxu0 %vm43_vm1, %v26_v6  ;;  %v1359_v16 = vld [vmem:[%s1600_s4 + $0x30] sm:$0xff]  ;;  %v1366_v17 = vld [vmem:[%s1600_s4 + $0x28] sm:$0xff]  ;;  %v30_v18 = vld [vmem:[%s1599_s0 + $0x20] sm:$0xff] }
   0x7   :  { %1023 = vmatprep.subr.mxu1 %v1208_v0  ;;  %1006 = vmatmul.mubr.msk.f32.vlgmr.msra.gmra.mxu0 %vm43_vm1, %v27_v8  ;;  %v31_v19 = vld [vmem:[%s1599_s0 + $0x28] sm:$0xff]  ;;  %v1380_v20 = vld [vmem:[%s1600_s4 + $0x20] sm:$0xff]  ;;  %v32_v21 = vld [vmem:[%s1599_s0 + $0x30] sm:$0xff] }
   0x8   :  { %1024 = vmatpush3.msra.mxu1 %v1284_v7  ;;  %1036 = vmatprep.subr.mxu0 %v1208_v0  ;;  %v1391_v22 = vld [vmem:[%s1600_s4 + $0x18] sm:$0xff]  ;;  %v1402_v24 = vld [vmem:[%s1600_s4 + $0x10] sm:$0xff]  ;;  %v1410_v25 = vld [vmem:[%s1600_s4 + $0x8] sm:$0xff] }
   0x9   :  { %1025 = vmatprep.subr.mxu1 %v1208_v0  ;;  %1037 = vmatpush3.msra.mxu0 %v1346_v13  ;;  %v33_v23 = vld [vmem:[%s1599_s0 + $0x38] sm:$0xff]  ;;  %v1419_v26 = vld [vmem:[%s1600_s4] sm:$0xff] }
   0xa   :  { %1026 = vmatpush3.msra.mxu1 %v1295_v9  ;;  %1008 = vmatprep.mubr.msk.f32.mxu0 %vm43_vm1, %v28_v14  ;;  %v1428_v28 = vld [vmem:[%s1601_s2] ss:$0 sm:$0xff]  ;;  %v804_v14 = vld [vmem:[%s1602_s5 + $0x38] sm:$0xff] }
   0xb   :  { %1027 = vmatprep.subr.mxu1 %v1208_v0  ;;  %1038 = vmatprep.subr.mxu0 %v1208_v0 }
   0xc   :  { %1028 = vmatpush3.msra.mxu1 %v1303_v10  ;;  %1009 = vmatmul.mubr.msk.f32.gmra.mxu0 %vm43_vm1, %v29_v15  ;;  %v803_v15 = vld [vmem:[%s1602_s5 + $0x30] sm:$0xff] }
   0xd   :  { %1029 = vmatprep.subr.mxu1 %v1208_v0  ;;  %1039 = vmatpush3.msra.mxu0 %v1359_v16 }
   0xe   :  { %1030 = vmatpush3.msra.mxu1 %v1311_v11  ;;  %1011 = vmatprep.mubr.msk.f32.mxu0 %vm43_vm1, %v30_v18  ;;  %v800_v18 = vld [vmem:[%s1602_s5 + $0x18] sm:$0xff] }
   0xf   :  { %1031 = vmatprep.subr.mxu1 %v1208_v0  ;;  %1040 = vmatprep.subr.mxu0 %v1208_v0 }
  0x10   :  { %1032 = vmatpush3.msra.mxu1 %v1318_v12  ;;  %1041 = vmatpush3.msra.mxu0 %v1366_v17 }
  0x11   :  { %1034 = vmatmul.mubr.f32.vlgmr.msra.gmra.mxu1 %v1208_v0  ;;  %1055 = vmatprep.subr.mxu1 %v1208_v0 }
  0x12   :  { %1056 = vmatpush3.msra.mxu1 %v1254_v1  ;;  %1071 = vmatprep.mubr.msk.f32.mxu1 %vm1209_vm0, %v1208_v0 }
  0x13   :  { %1057 = vmatprep.subr.mxu1 %v1208_v0  ;;  %1042 = vmatprep.subr.mxu0 %v1208_v0 }
  0x14   :  { %1058 = vmatpush3.msra.mxu1 %v1259_v2  ;;  %1012 = vmatmul.mubr.msk.f32.gmra.mxu0 %vm43_vm1, %v31_v19  ;;  %v799_v19 = vld [vmem:[%s1602_s5 + $0x10] sm:$0xff] }
  0x15   :  { %1059 = vmatprep.subr.mxu1 %v1208_v0  ;;  %1043 = vmatpush3.msra.mxu0 %v1380_v20 }
  0x16   :  { %1060 = vmatpush3.msra.mxu1 %v1274_v5  ;;  %1014 = vmatprep.mubr.msk.f32.mxu0 %vm43_vm1, %v32_v21  ;;  %v797_v21 = vld [vmem:[%s1602_s5] sm:$0xff] }
  0x17   :  { %1061 = vmatprep.subr.mxu1 %v1208_v0  ;;  %1044 = vmatprep.subr.mxu0 %v1208_v0 }
  0x18   :  { %1062 = vmatpush3.msra.mxu1 %v1284_v7  ;;  %1045 = vmatpush3.msra.mxu0 %v1391_v22 }
  0x19   :  { %1063 = vmatprep.subr.mxu1 %v1208_v0  ;;  %1046 = vmatprep.subr.mxu0 %v1208_v0 }
  0x1a   :  { %1064 = vmatpush3.msra.mxu1 %v1295_v9  ;;  %1015 = vmatmul.mubr.msk.f32.gmra.mxu0 %vm43_vm1, %v33_v23 }
  0x1b   :  { %1065 = vmatprep.subr.mxu1 %v1208_v0  ;;  %1047 = vmatpush3.msra.mxu0 %v1402_v24 }
  0x1c   :  { %1066 = vmatpush3.msra.mxu1 %v1303_v10  ;;  %1052 = vmatprep.mubr.msk.f32.mxu0 %vm1209_vm0, %v1208_v0 }
  0x1d   :  { %1067 = vmatprep.subr.mxu1 %v1208_v0  ;;  %1048 = vmatprep.subr.mxu0 %v1208_v0 }
  0x1e   :  { %1068 = vmatpush3.msra.mxu1 %v1311_v11  ;;  %1049 = vmatpush3.msra.mxu0 %v1410_v25 }
  0x1f   :  { %1069 = vmatprep.subr.mxu1 %v1208_v0  ;;  %1050 = vmatprep.subr.mxu0 %v1208_v0 }
  0x20   :  { %1070 = vmatpush3.msra.mxu1 %v1318_v12  ;;  %1051 = vmatpush3.msra.mxu0 %v1419_v26 }
  0x21   :  { %1093 = vmatprep.subr.mxu1 %v1208_v0  ;;  %1074 = vmatprep.subr.mxu0 %v1208_v0 }
  0xc7   :  { %v1007_v27 = vpop.f32.mrf.mxu0 }
  0xc8   :  { %v140_v44 = vadd.f32 %v1007_v27, %v1428_v28  ;;  %v908_v27 = vld [vmem:[%s1603_s6] ss:$0 sm:$0xff] }
  0xc9   :  { %v134_v29 = vpop.f32.mrf.mxu0 }
  0xca   :  { %v135_v30 = vadd.f32 %v1428_v28, %v134_v29 }
  0xcc   :  { %v1010_v38 = vpop.f32.mrf.mxu0 }
  0xcd   :  { %v150_v55 = vadd.f32 %v1010_v38, %v1428_v28 }
  0xce   :  { %v144_v39 = vpop.f32.mrf.mxu0 }
  0xcf   :  { %v145_v49 = vadd.f32 %v1428_v28, %v144_v39 }
  0xd1   :  { %v262_v31 = vpop.f32.mrf.mxu1 }
  0xd2   :  { %v266_v32 = vadd.f32 %v262_v31, %v135_v30 }
  0xd3   :  { %v1035_v33 = vpop.f32.mrf.mxu1 }
  0xd4   :  { %1190 = vtanh.f32 %v266_v32  ;;  %v1455_v40 = vpop.f32.mrf.mxu0 }
  0xd5   :  { %v160_v3 = vadd.f32 %v1455_v40, %v1428_v28 }
  0xd6   :  { %v1457_v41 = vpop.f32.mrf.mxu0 }
  0xd7   :  { %v155_v60 = vadd.f32 %v1428_v28, %v1457_v41 }
  0xda   :  { %v1459_v42 = vpop.f32.mrf.mxu0 }
  0xdc   :  { %v1461_v43 = vpop.f32.mrf.mxu0 }
  0xdd   :  { %v165_v8 = vadd.f32 %v1428_v28, %v1461_v43 }
  0xe1   :  { %v1191_v36 = vpop.eup %1190 }
  0xe2   :  { %v268_v37 = vsel %vm191_vm2, %v1191_v36, 0.0 }
  0xe3   :  { %1053 = vmatmul.mubr.msk.f32.vlgmr.msra.gmra.mxu0 %vm192_vm3, %v268_v37 }
  0xe4   :  { %1075 = vmatpush3.msra.mxu0 %v1346_v13  ;;  %1090 = vmatprep.mubr.msk.f32.mxu0 %vm1209_vm0, %v1208_v0 }
  0xe5   :  { %1076 = vmatprep.subr.mxu0 %v1208_v0 }
  0xe6   :  { %1077 = vmatpush3.msra.mxu0 %v1359_v16 }
  0xe7   :  { %1078 = vmatprep.subr.mxu0 %v1208_v0 }
  0xe8   :  { %1079 = vmatpush3.msra.mxu0 %v1366_v17 }
  0xe9   :  { %1080 = vmatprep.subr.mxu0 %v1208_v0 }
  0xea   :  { %1081 = vmatpush3.msra.mxu0 %v1380_v20 }
  0xeb   :  { %1082 = vmatprep.subr.mxu0 %v1208_v0 }
  0xec   :  { %1083 = vmatpush3.msra.mxu0 %v1391_v22 }
  0xed   :  { %1084 = vmatprep.subr.mxu0 %v1208_v0 }
  0xee   :  { %1085 = vmatpush3.msra.mxu0 %v1402_v24 }
  0xef   :  { %1086 = vmatprep.subr.mxu0 %v1208_v0 }
  0xf0   :  { %1087 = vmatpush3.msra.mxu0 %v1410_v25 }
  0xf1   :  { %1088 = vmatprep.subr.mxu0 %v1208_v0 }
  0xf2   :  { %1089 = vmatpush3.msra.mxu0 %v1419_v26 }
  0xf3   :  { %1112 = vmatprep.subr.mxu0 %v1208_v0 }
 0x1a3   :  { %v338_v45 = vpop.f32.mrf.mxu0 }
 0x1a4   :  { %v342_v46 = vadd.f32 %v338_v45, %v140_v44 }
 0x1a5   :  { %v1054_v47 = vpop.f32.mrf.mxu0 }
 0x1a6   :  { %1192 = vtanh.f32 %v342_v46 }
 0x1b3   :  { %v1193_v48 = vpop.eup %1192 }
 0x1b4   :  { %1072 = vmatmul.mubr.msk.f32.vlgmr.msra.gmra.mxu1 %vm192_vm3, %v1193_v48 }
 0x1b5   :  { %1094 = vmatpush3.msra.mxu1 %v1254_v1  ;;  %1109 = vmatprep.mubr.msk.f32.mxu1 %vm1209_vm0, %v1208_v0 }
 0x1b6   :  { %1095 = vmatprep.subr.mxu1 %v1208_v0 }
 0x1b7   :  { %1096 = vmatpush3.msra.mxu1 %v1259_v2 }
 0x1b8   :  { %1097 = vmatprep.subr.mxu1 %v1208_v0 }
 0x1b9   :  { %1098 = vmatpush3.msra.mxu1 %v1274_v5 }
 0x1ba   :  { %1099 = vmatprep.subr.mxu1 %v1208_v0 }
 0x1bb   :  { %1100 = vmatpush3.msra.mxu1 %v1284_v7 }
 0x1bc   :  { %1101 = vmatprep.subr.mxu1 %v1208_v0 }
 0x1bd   :  { %1102 = vmatpush3.msra.mxu1 %v1295_v9 }
 0x1be   :  { %1103 = vmatprep.subr.mxu1 %v1208_v0 }
 0x1bf   :  { %1104 = vmatpush3.msra.mxu1 %v1303_v10 }
 0x1c0   :  { %1105 = vmatprep.subr.mxu1 %v1208_v0 }
 0x1c1   :  { %1106 = vmatpush3.msra.mxu1 %v1311_v11 }
 0x1c2   :  { %1107 = vmatprep.subr.mxu1 %v1208_v0 }
 0x1c3   :  { %1108 = vmatpush3.msra.mxu1 %v1318_v12 }
 0x1c4   :  { %1131 = vmatprep.subr.mxu1 %v1208_v0 }
 0x274   :  { %v413_v50 = vpop.f32.mrf.mxu1 }
 0x275   :  { %v417_v51 = vadd.f32 %v413_v50, %v145_v49 }
 0x276   :  { %v1073_v52 = vpop.f32.mrf.mxu1 }
 0x277   :  { %1194 = vtanh.f32 %v417_v51 }
 0x284   :  { %v1195_v53 = vpop.eup %1194 }
 0x285   :  { %v419_v54 = vsel %vm191_vm2, %v1195_v53, %v1193_v48 }
 0x286   :  { %1091 = vmatmul.mubr.msk.f32.vlgmr.msra.gmra.mxu0 %vm192_vm3, %v419_v54 }
 0x287   :  { %1113 = vmatpush3.msra.mxu0 %v1346_v13  ;;  %1128 = vmatprep.mubr.msk.f32.mxu0 %vm1209_vm0, %v1208_v0 }
 0x288   :  { %1114 = vmatprep.subr.mxu0 %v1208_v0 }
 0x289   :  { %1115 = vmatpush3.msra.mxu0 %v1359_v16 }
 0x28a   :  { %1116 = vmatprep.subr.mxu0 %v1208_v0 }
 0x28b   :  { %1117 = vmatpush3.msra.mxu0 %v1366_v17 }
 0x28c   :  { %1118 = vmatprep.subr.mxu0 %v1208_v0 }
 0x28d   :  { %1119 = vmatpush3.msra.mxu0 %v1380_v20 }
 0x28e   :  { %1120 = vmatprep.subr.mxu0 %v1208_v0 }
 0x28f   :  { %1121 = vmatpush3.msra.mxu0 %v1391_v22 }
 0x290   :  { %1122 = vmatprep.subr.mxu0 %v1208_v0 }
 0x291   :  { %1123 = vmatpush3.msra.mxu0 %v1402_v24 }
 0x292   :  { %1124 = vmatprep.subr.mxu0 %v1208_v0 }
 0x293   :  { %1125 = vmatpush3.msra.mxu0 %v1410_v25 }
 0x294   :  { %1126 = vmatprep.subr.mxu0 %v1208_v0 }
 0x295   :  { %1127 = vmatpush3.msra.mxu0 %v1419_v26 }
 0x296   :  { %1150 = vmatprep.subr.mxu0 %v1208_v0 }
 0x346   :  { %v489_v56 = vpop.f32.mrf.mxu0 }
 0x347   :  { %v493_v57 = vadd.f32 %v489_v56, %v150_v55 }
 0x348   :  { %v1092_v58 = vpop.f32.mrf.mxu0 }
 0x349   :  { %1196 = vtanh.f32 %v493_v57 }
 0x356   :  { %v1197_v59 = vpop.eup %1196 }
 0x357   :  { %1110 = vmatmul.mubr.msk.f32.vlgmr.msra.gmra.mxu1 %vm192_vm3, %v1197_v59 }
 0x358   :  { %1132 = vmatpush3.msra.mxu1 %v1254_v1  ;;  %1147 = vmatprep.mubr.msk.f32.mxu1 %vm1209_vm0, %v1208_v0 }
 0x359   :  { %1133 = vmatprep.subr.mxu1 %v1208_v0 }
 0x35a   :  { %1134 = vmatpush3.msra.mxu1 %v1259_v2 }
 0x35b   :  { %1135 = vmatprep.subr.mxu1 %v1208_v0 }
 0x35c   :  { %1136 = vmatpush3.msra.mxu1 %v1274_v5 }
 0x35d   :  { %1137 = vmatprep.subr.mxu1 %v1208_v0 }
 0x35e   :  { %1138 = vmatpush3.msra.mxu1 %v1284_v7 }
 0x35f   :  { %1139 = vmatprep.subr.mxu1 %v1208_v0 }
 0x360   :  { %1140 = vmatpush3.msra.mxu1 %v1295_v9 }
 0x361   :  { %1141 = vmatprep.subr.mxu1 %v1208_v0 }
 0x362   :  { %1142 = vmatpush3.msra.mxu1 %v1303_v10 }
 0x363   :  { %1143 = vmatprep.subr.mxu1 %v1208_v0 }
 0x364   :  { %1144 = vmatpush3.msra.mxu1 %v1311_v11 }
 0x365   :  { %1145 = vmatprep.subr.mxu1 %v1208_v0 }
 0x366   :  { %1146 = vmatpush3.msra.mxu1 %v1318_v12 }
 0x367   :  { %1169 = vmatprep.subr.mxu1 %v1208_v0 }
 0x417   :  { %v564_v61 = vpop.f32.mrf.mxu1 }
 0x418   :  { %v568_v62 = vadd.f32 %v564_v61, %v155_v60 }
 0x419   :  { %v1111_v63 = vpop.f32.mrf.mxu1 }
 0x41a   :  { %1198 = vtanh.f32 %v568_v62 }
 0x427   :  { %v1199_v1 = vpop.eup %1198 }
 0x428   :  { %v570_v2 = vsel %vm191_vm2, %v1199_v1, %v1197_v59 }
 0x429   :  { %1129 = vmatmul.mubr.msk.f32.vlgmr.msra.gmra.mxu0 %vm192_vm3, %v570_v2 }
 0x42a   :  { %1151 = vmatpush3.msra.mxu0 %v1346_v13  ;;  %1166 = vmatprep.mubr.msk.f32.mxu0 %vm1209_vm0, %v1208_v0 }
 0x42b   :  { %1152 = vmatprep.subr.mxu0 %v1208_v0 }
 0x42c   :  { %1153 = vmatpush3.msra.mxu0 %v1359_v16  ;;  %v802_v16 = vld [vmem:[%s1602_s5 + $0x28] sm:$0xff] }
 0x42d   :  { %1154 = vmatprep.subr.mxu0 %v1208_v0 }
 0x42e   :  { %1155 = vmatpush3.msra.mxu0 %v1366_v17  ;;  %v801_v17 = vld [vmem:[%s1602_s5 + $0x20] sm:$0xff] }
 0x42f   :  { %1156 = vmatprep.subr.mxu0 %v1208_v0 }
 0x430   :  { %1157 = vmatpush3.msra.mxu0 %v1380_v20  ;;  %v798_v20 = vld [vmem:[%s1602_s5 + $0x8] sm:$0xff] }
 0x431   :  { %1158 = vmatprep.subr.mxu0 %v1208_v0 }
 0x432   :  { %1159 = vmatpush3.msra.mxu0 %v1391_v22  ;;  %v170_v22 = vadd.f32 %v1459_v42, %v1428_v28 }
 0x433   :  { %1160 = vmatprep.subr.mxu0 %v1208_v0 }
 0x434   :  { %1161 = vmatpush3.msra.mxu0 %v1402_v24 }
 0x435   :  { %1162 = vmatprep.subr.mxu0 %v1208_v0 }
 0x436   :  { %1163 = vmatpush3.msra.mxu0 %v1410_v25 }
 0x437   :  { %1164 = vmatprep.subr.mxu0 %v1208_v0 }
 0x438   :  { %1165 = vmatpush3.msra.mxu0 %v1419_v26 }
 0x4e9   :  { %v640_v4 = vpop.f32.mrf.mxu0 }
 0x4ea   :  { %v644_v5 = vadd.f32 %v640_v4, %v160_v3 }
 0x4eb   :  { %v1130_v6 = vpop.f32.mrf.mxu0 }
 0x4ec   :  { %1200 = vtanh.f32 %v644_v5 }
 0x4f9   :  { %v1201_v7 = vpop.eup %1200 }
 0x4fa   :  { %1148 = vmatmul.mubr.msk.f32.vlgmr.msra.gmra.mxu1 %vm192_vm3, %v1201_v7 }
 0x4fb   :  { %1185 = vmatprep.mubr.msk.f32.mxu1 %vm1209_vm0, %v1208_v0  ;;  %1170 = vmatpush3.msra.mxu1 %v804_v14 }
 0x4fc   :  { %1171 = vmatprep.subr.mxu1 %v1208_v0 }
 0x4fd   :  { %1172 = vmatpush3.msra.mxu1 %v803_v15 }
 0x4fe   :  { %1173 = vmatprep.subr.mxu1 %v1208_v0 }
 0x4ff   :  { %1174 = vmatpush3.msra.mxu1 %v802_v16 }
 0x500   :  { %1175 = vmatprep.subr.mxu1 %v1208_v0 }
 0x501   :  { %1176 = vmatpush3.msra.mxu1 %v801_v17 }
 0x502   :  { %1177 = vmatprep.subr.mxu1 %v1208_v0 }
 0x503   :  { %1178 = vmatpush3.msra.mxu1 %v800_v18 }
 0x504   :  { %1179 = vmatprep.subr.mxu1 %v1208_v0 }
 0x505   :  { %1180 = vmatpush3.msra.mxu1 %v799_v19 }
 0x506   :  { %1181 = vmatprep.subr.mxu1 %v1208_v0 }
 0x507   :  { %1182 = vmatpush3.msra.mxu1 %v798_v20 }
 0x508   :  { %1183 = vmatprep.subr.mxu1 %v1208_v0 }
 0x509   :  { %1184 = vmatpush3.msra.mxu1 %v797_v21 }
 0x5ba   :  { %v715_v9 = vpop.f32.mrf.mxu1 }
 0x5bb   :  { %v719_v10 = vadd.f32 %v715_v9, %v165_v8 }
 0x5bc   :  { %v1149_v11 = vpop.f32.mrf.mxu1 }
 0x5bd   :  { %1202 = vtanh.f32 %v719_v10 }
 0x5ca   :  { %v1203_v12 = vpop.eup %1202 }
 0x5cb   :  { %v721_v13 = vsel %vm191_vm2, %v1203_v12, %v1201_v7 }
 0x5cc   :  { %1167 = vmatmul.mubr.msk.f32.vlgmr.msra.gmra.mxu0 %vm192_vm3, %v721_v13 }
 0x68c   :  { %v791_v23 = vpop.f32.mrf.mxu0 }
 0x68d   :  { %v795_v24 = vadd.f32 %v791_v23, %v170_v22 }
 0x68e   :  { %v1168_v25 = vpop.f32.mrf.mxu0 }
 0x68f   :  { %1204 = vtanh.f32 %v795_v24 }
 0x69c   :  { %v1205_v26 = vpop.eup %1204 }
 0x69d   :  { %1186 = vmatmul.mubr.msk.f32.vlgmr.msra.gmra.mxu1 %vm192_vm3, %v1205_v26 }
 0x75d   :  { %v881_v29 = vpop.f32.mrf.mxu1 }
 0x75e   :  { %v882_v30 = vadd.f32 %v908_v27, %v881_v29 }
 0x75f   :  { %v1187_v31 = vpop.f32.mrf.mxu1 }
 0x760   :  { %1206 = vtanh.f32 %v882_v30 }
 0x76d   :  { %v1207_v0 = vpop.eup %1206 }
 0x76e   :  { %887 = vst.msk [vmem:[%s1604_s7] sm:$0xff] %vm886_vm4, %v1207_v0 }

</bundles_post_ra>
